<compile_context>
chip_gen: v7x
topology: tpu7x:2x2x1
jax: 0.10.0
libtpu: 0.0.40
codegen_flags: <defaults>
</compile_context>

<pallas_src>
import functools

import jax
import jax.numpy as jnp
from jax.experimental import pallas as pl
from jax.experimental.pallas import tpu as pltpu

HIDDEN = 64
PACKED = 2 * HIDDEN  # 128: two batch rows per lane-dense vreg row


def _round_up(x, m):
    return ((x + m - 1) // m) * m


def _orthogonal(key, shape, gain):
    """Deterministic orthogonal init (matches torch.nn.init.orthogonal_ semantics)."""
    a = jax.random.normal(key, shape, dtype=jnp.float32)
    q, r = jnp.linalg.qr(a)
    q = q * jnp.sign(jnp.diag(r))[None, :]
    return gain * q


def _block_diag2(w):
    """[[w, 0], [0, w]] : (64,64) -> (128,128)."""
    z = jnp.zeros_like(w)
    top = jnp.concatenate([w, z], axis=1)
    bot = jnp.concatenate([z, w], axis=1)
    return jnp.concatenate([top, bot], axis=0)


def residual_kernel(x_ref, w1_ref, b1_ref, w2_ref, b2_ref, o_ref):
    x = x_ref[...]
    h = jnp.dot(x, w1_ref[...], preferred_element_type=jnp.float32) + b1_ref[...]
    h = jnp.tanh(h)
    h = jnp.dot(h, w2_ref[...], preferred_element_type=jnp.float32) + b2_ref[...]
    h = jnp.tanh(h)
    o_ref[...] = jnp.tanh(h + x)


@functools.partial(jax.jit, static_argnames=("block_rows",))
def residual_forward(features, w1, b1, w2, b2, *, block_rows=512):
    """features: (B, 64) f32.  w1/w2 stored as [in, out] (64,64).  b1/b2: (1,64)."""
    B, D = features.shape
    assert D == HIDDEN

    # --- packed-row geometry ------------------------------------------------
    p_needed = pl.cdiv(B, 2)  # packed rows of 128 lanes
    # Big tile, but (a) multiple of 8 sublanes, (b) <= half the work when
    # possible so the grid has >=2 steps (v7x megacore sharding).
    eff = min(block_rows, max(8, _round_up(pl.cdiv(p_needed, 2), 8)))
    p_pad = _round_up(p_needed, eff)
    b_pad = 2 * p_pad

    x = features
    if b_pad != B:
        x = jnp.pad(x, ((0, b_pad - B), (0, 0)))
    x_packed = x.reshape(p_pad, PACKED)

    # Block-diagonal weights / duplicated biases (built once per call; tiny).
    w1p = _block_diag2(w1)
    w2p = _block_diag2(w2)
    b1p = jnp.concatenate([b1, b1], axis=-1)
    b2p = jnp.concatenate([b2, b2], axis=-1)

    grid = (p_pad // eff,)

    tile_bytes = eff * PACKED * 4
    vmem_limit = int(
        2 * 2 * tile_bytes                 # x + out tiles, double-buffered
        + 2 * (2 * PACKED * PACKED * 4)    # w1p, w2p (resident, buffered)
        + 2 * (2 * PACKED * 4)             # b1p, b2p
        + (8 << 20)                        # headroom
    )

    out_packed = pl.pallas_call(
        residual_kernel,
        out_shape=jax.ShapeDtypeStruct((p_pad, PACKED), features.dtype),
        grid_spec=pltpu.PrefetchScalarGridSpec(
            num_scalar_prefetch=0,
            grid=grid,
            in_specs=[
                pl.BlockSpec((eff, PACKED), lambda i: (i, 0)),     # x tile
                pl.BlockSpec((PACKED, PACKED), lambda i: (0, 0)),  # W1 block-diag
                pl.BlockSpec((1, PACKED), lambda i: (0, 0)),       # b1 packed
                pl.BlockSpec((PACKED, PACKED), lambda i: (0, 0)),  # W2 block-diag
                pl.BlockSpec((1, PACKED), lambda i: (0, 0)),       # b2 packed
            ],
            out_specs=pl.BlockSpec((eff, PACKED), lambda i: (i, 0)),
        ),
        compiler_params=pltpu.CompilerParams(
            dimension_semantics=("parallel",),
            vmem_limit_bytes=vmem_limit,
        ),
    )(x_packed, w1p, b1p, w2p, b2p)

    out = out_packed.reshape(b_pad, HIDDEN)
    return out[:B]


def reference_forward(features, w1, b1, w2, b2):
    h = jnp.tanh(features @ w1 + b1)
    h = jnp.tanh(h @ w2 + b2)
    return jnp.tanh(h + features)


if __name__ == "__main__":
    key = jax.random.PRNGKey(0)
    k_x, k_x2, k_w1, k_w2 = jax.random.split(key, 4)

    gain = float(jnp.sqrt(2.0))
    # PyTorch Linear weight is [out, in]; we store the transpose [in, out] so
    # the kernel does x @ W. Orthogonal init is distribution-equivalent.
    w1 = _orthogonal(k_w1, (HIDDEN, HIDDEN), gain)
    w2 = _orthogonal(k_w2, (HIDDEN, HIDDEN), gain)
    b1 = jnp.zeros((1, HIDDEN), dtype=jnp.float32)
    b2 = jnp.zeros((1, HIDDEN), dtype=jnp.float32)

    # Small demo batch.
    B = 8
    features = jax.random.normal(k_x, (B, HIDDEN), dtype=jnp.float32)
    out = jax.block_until_ready(residual_forward(features, w1, b1, w2, b2))
    ref = reference_forward(features, w1, b1, w2, b2)
    assert out.shape == (B, HIDDEN)
    assert jnp.allclose(out, ref, atol=1e-5, rtol=1e-5), "mismatch vs reference (B=8)"

    # Exercise the padding / multi-tile path with a non-aligned batch.
    B2 = 50
    features2 = jax.random.normal(k_x2, (B2, HIDDEN), dtype=jnp.float32)
    out2 = jax.block_until_ready(residual_forward(features2, w1, b1, w2, b2))
    ref2 = reference_forward(features2, w1, b1, w2, b2)
    assert out2.shape == (B2, HIDDEN)
    assert jnp.allclose(out2, ref2, atol=1e-5, rtol=1e-5), "mismatch vs reference (B=50)"

    print("KERNEL_OK")
</pallas_src>

<mosaic_0001>
module attributes {stable_mosaic.version = 11 : i64} {
  func.func @residual_kernel(%arg0: i32, %arg1: memref<8x128xf32, #tpu.memory_space<vmem>>, %arg2: memref<128x128xf32, #tpu.memory_space<vmem>>, %arg3: memref<1x128xf32, #tpu.memory_space<vmem>>, %arg4: memref<128x128xf32, #tpu.memory_space<vmem>>, %arg5: memref<1x128xf32, #tpu.memory_space<vmem>>, %arg6: memref<8x128xf32, #tpu.memory_space<vmem>>) attributes {dimension_semantics = [#tpu.dimension_semantics<parallel>], iteration_bounds = array<i64: 1>, scalar_prefetch = 0 : i64, scratch_operands = 0 : i64, tpu.core_type = #tpu.core_type<tc>, window_params = [{transform_indices = @transform_0, window_bounds = array<i64: 8, 128>}, {pipeline_mode = #tpu.pipeline_mode<synchronous>, transform_indices = @transform_1, window_bounds = array<i64: 128, 128>}, {pipeline_mode = #tpu.pipeline_mode<synchronous>, transform_indices = @transform_2, window_bounds = array<i64: 1, 128>}, {pipeline_mode = #tpu.pipeline_mode<synchronous>, transform_indices = @transform_3, window_bounds = array<i64: 128, 128>}, {pipeline_mode = #tpu.pipeline_mode<synchronous>, transform_indices = @transform_4, window_bounds = array<i64: 1, 128>}, {transform_indices = @transform_5, window_bounds = array<i64: 8, 128>}]} {
    %c0 = arith.constant 0 : index
    %c0_0 = arith.constant 0 : index
    %0 = vector.load %arg1[%c0, %c0_0] : memref<8x128xf32, #tpu.memory_space<vmem>>, vector<8x128xf32>
    %c0_1 = arith.constant 0 : index
    %c0_2 = arith.constant 0 : index
    %1 = vector.load %arg2[%c0_1, %c0_2] : memref<128x128xf32, #tpu.memory_space<vmem>>, vector<128x128xf32>
    %cst = arith.constant dense<0.000000e+00> : vector<8x128xf32>
    %2 = tpu.matmul %0, %1, %cst {dimension_numbers = #tpu.dot_dimension_numbers<[1], [0], [0], [1], [0, 0, 1, 1], [], []>} : vector<8x128xf32>, vector<128x128xf32>, vector<8x128xf32> -> vector<8x128xf32>
    %c0_3 = arith.constant 0 : index
    %c0_4 = arith.constant 0 : index
    %3 = vector.load %arg3[%c0_3, %c0_4] : memref<1x128xf32, #tpu.memory_space<vmem>>, vector<1x128xf32>
    %4 = vector.broadcast %3 : vector<1x128xf32> to vector<8x128xf32>
    %5 = arith.addf %2, %4 : vector<8x128xf32>
    %6 = math.tanh %5 : vector<8x128xf32>
    %c0_5 = arith.constant 0 : index
    %c0_6 = arith.constant 0 : index
    %7 = vector.load %arg4[%c0_5, %c0_6] : memref<128x128xf32, #tpu.memory_space<vmem>>, vector<128x128xf32>
    %cst_7 = arith.constant dense<0.000000e+00> : vector<8x128xf32>
    %8 = tpu.matmul %6, %7, %cst_7 {dimension_numbers = #tpu.dot_dimension_numbers<[1], [0], [0], [1], [0, 0, 1, 1], [], []>} : vector<8x128xf32>, vector<128x128xf32>, vector<8x128xf32> -> vector<8x128xf32>
    %c0_8 = arith.constant 0 : index
    %c0_9 = arith.constant 0 : index
    %9 = vector.load %arg5[%c0_8, %c0_9] : memref<1x128xf32, #tpu.memory_space<vmem>>, vector<1x128xf32>
    %10 = vector.broadcast %9 : vector<1x128xf32> to vector<8x128xf32>
    %11 = arith.addf %8, %10 : vector<8x128xf32>
    %12 = math.tanh %11 : vector<8x128xf32>
    %13 = arith.addf %12, %0 : vector<8x128xf32>
    %14 = math.tanh %13 : vector<8x128xf32>
    %c0_10 = arith.constant 0 : index
    %c0_11 = arith.constant 0 : index
    %15 = vector.load %arg6[%c0_10, %c0_11] : memref<8x128xf32, #tpu.memory_space<vmem>>, vector<8x128xf32>
    tpu.vector_store %arg6[%c0_10, %c0_11], %14 {strides = array<i32>} : memref<8x128xf32, #tpu.memory_space<vmem>>, vector<8x128xf32>,
    return
  }
  func.func @transform_0(%arg0: i32) -> (i32, i32) {
    %c0_i32 = arith.constant 0 : i32
    %c0_i32_0 = arith.constant 0 : i32
    return %arg0, %c0_i32 : i32, i32
  }
  func.func @transform_1(%arg0: i32) -> (i32, i32) {
    %c0_i32 = arith.constant 0 : i32
    %c0_i32_0 = arith.constant 0 : i32
    %c0_i32_1 = arith.constant 0 : i32
    return %c0_i32, %c0_i32_0 : i32, i32
  }
  func.func @transform_2(%arg0: i32) -> (i32, i32) {
    %c0_i32 = arith.constant 0 : i32
    %c0_i32_0 = arith.constant 0 : i32
    %c0_i32_1 = arith.constant 0 : i32
    return %c0_i32, %c0_i32_0 : i32, i32
  }
  func.func @transform_3(%arg0: i32) -> (i32, i32) {
    %c0_i32 = arith.constant 0 : i32
    %c0_i32_0 = arith.constant 0 : i32
    %c0_i32_1 = arith.constant 0 : i32
    return %c0_i32, %c0_i32_0 : i32, i32
  }
  func.func @transform_4(%arg0: i32) -> (i32, i32) {
    %c0_i32 = arith.constant 0 : i32
    %c0_i32_0 = arith.constant 0 : i32
    %c0_i32_1 = arith.constant 0 : i32
    return %c0_i32, %c0_i32_0 : i32, i32
  }
  func.func @transform_5(%arg0: i32) -> (i32, i32) {
    %c0_i32 = arith.constant 0 : i32
    %c0_i32_0 = arith.constant 0 : i32
    return %arg0, %c0_i32 : i32, i32
  }
}

</mosaic_0001>

<bundles_post_ra>
// kernel: residual_forward.1
= control target key start
LH: loop header
LB: loop body
LE: loop exit
PB: predicated region body
PF: predicated region fallthrough
CT: control target
= control target key end

     0   :  { %v379_v0 = vmov 0.0|0.0   ;;  %vm380_vm0 = vmmov 0   ;;  %v381_v4 = vmov 0.0   ;;  %s536_s1 = inlined_call_operand.vmem [shape: f32[128,128], index: 1, kind: input, shape index: {}]   ;;  %s537_s3 = inlined_call_operand.vmem [shape: f32[128,128], index: 3, kind: input, shape index: {}]   ;;  %s538_s0 = inlined_call_operand.vmem [shape: f32[8,128], index: 0, kind: input, shape index: {}]   ;;  %s539_s2 = inlined_call_operand.vmem [shape: f32[1,128], index: 2, kind: input, shape index: {}]   ;;  %s540_s4 = inlined_call_operand.vmem [shape: f32[1,128], index: 4, kind: input, shape index: {}]   ;;  %s541_s5 = inlined_call_operand.vmem [shape: f32[8,128], index: 5, kind: output, shape index: {}]  }
   0x1   :  { %322 = vmatprep.subr.bf16.mxu0 %v379_v0  ;;  %v21_v1 = vld [vmem:[%s536_s1] sm:$0xff]  ;;  %v22_v2 = vld [vmem:[%s536_s1 + $0x8] sm:$0xff]  ;;  %v23_v3 = vld [vmem:[%s536_s1 + $0x10] sm:$0xff]  ;;  %284 = vmatprep.mubr.msk.f32.mxu0 %vm380_vm0, %v381_v4 }
   0x2   :  { %v323_v5 = vpack.c.bf16 %v22_v2, %v21_v1  ;;  %v24_v6 = vld [vmem:[%s536_s1 + $0x18] sm:$0xff]  ;;  %346 = vmatprep.subr.bf16.mxu1 %v379_v0  ;;  %319 = vmatprep.mubr.msk.f32.mxu1 %vm380_vm0, %v381_v4  ;;  %v25_v8 = vld [vmem:[%s536_s1 + $0x20] sm:$0xff]  ;;  %v26_v9 = vld [vmem:[%s536_s1 + $0x28] sm:$0xff] }
   0x3   :  { %v326_v7 = vpack.c.bf16 %v24_v6, %v23_v3  ;;  %v115_v10 = vld [vmem:[%s537_s3] sm:$0xff]  ;;  %v116_v11 = vld [vmem:[%s537_s3 + $0x8] sm:$0xff]  ;;  %v117_v12 = vld [vmem:[%s537_s3 + $0x10] sm:$0xff]  ;;  %v329_v14 = vpack.c.bf16 %v26_v9, %v25_v8 }
   0x4   :  { %324 = vmatpush3.bf16.msra.mxu0 %v323_v5  ;;  %v118_v13 = vld [vmem:[%s537_s3 + $0x18] sm:$0xff]  ;;  %v347_v15 = vpack.c.bf16 %v116_v11, %v115_v10  ;;  %v27_v16 = vld [vmem:[%s536_s1 + $0x30] sm:$0xff]  ;;  %v119_v19 = vld [vmem:[%s537_s3 + $0x20] sm:$0xff] }
   0x5   :  { %325 = vmatprep.subr.bf16.mxu0 %v379_v0  ;;  %v28_v17 = vld [vmem:[%s536_s1 + $0x38] sm:$0xff]  ;;  %v350_v18 = vpack.c.bf16 %v118_v13, %v117_v12  ;;  %v120_v20 = vld [vmem:[%s537_s3 + $0x28] sm:$0xff]  ;;  %v29_v22 = vld [vmem:[%s536_s1 + $0x40] sm:$0xff] }
   0x6   :  { %348 = vmatpush3.bf16.msra.mxu1 %v347_v15  ;;  %v332_v21 = vpack.c.bf16 %v28_v17, %v27_v16  ;;  %v30_v23 = vld [vmem:[%s536_s1 + $0x48] sm:$0xff]  ;;  %v353_v24 = vpack.c.bf16 %v120_v20, %v119_v19  ;;  %v121_v25 = vld [vmem:[%s537_s3 + $0x30] sm:$0xff]  ;;  %v122_v26 = vld [vmem:[%s537_s3 + $0x38] sm:$0xff] }
   0x7   :  { %349 = vmatprep.subr.bf16.mxu1 %v379_v0  ;;  %v335_v27 = vpack.c.bf16 %v30_v23, %v29_v22  ;;  %v31_v28 = vld [vmem:[%s536_s1 + $0x50] sm:$0xff]  ;;  %v32_v29 = vld [vmem:[%s536_s1 + $0x58] sm:$0xff]  ;;  %v356_v30 = vpack.c.bf16 %v122_v26, %v121_v25  ;;  %v123_v31 = vld [vmem:[%s537_s3 + $0x40] sm:$0xff] }
   0x8   :  { %327 = vmatpush3.bf16.msra.mxu0 %v326_v7  ;;  %v124_v32 = vld [vmem:[%s537_s3 + $0x48] sm:$0xff]  ;;  %v338_v33 = vpack.c.bf16 %v32_v29, %v31_v28  ;;  %v33_v34 = vld [vmem:[%s536_s1 + $0x60] sm:$0xff]  ;;  %v35_v38 = vld [vmem:[%s536_s1 + $0x70] sm:$0xff] }
   0x9   :  { %328 = vmatprep.subr.bf16.mxu0 %v379_v0  ;;  %v34_v35 = vld [vmem:[%s536_s1 + $0x68] sm:$0xff]  ;;  %v359_v36 = vpack.c.bf16 %v124_v32, %v123_v31  ;;  %v36_v39 = vld [vmem:[%s536_s1 + $0x78] sm:$0xff]  ;;  %v20_v41 = vld [vmem:[%s538_s0] sm:$0xff] }
   0xa   :  { %351 = vmatpush3.bf16.msra.mxu1 %v350_v18  ;;  %v341_v37 = vpack.c.bf16 %v34_v35, %v33_v34  ;;  %v344_v40 = vpack.c.bf16 %v36_v39, %v35_v38  ;;  %v125_v42 = vld [vmem:[%s537_s3 + $0x50] sm:$0xff]  ;;  %v126_v43 = vld [vmem:[%s537_s3 + $0x58] sm:$0xff]  ;;  %v127_v45 = vld [vmem:[%s537_s3 + $0x60] sm:$0xff] }
   0xb   :  { %352 = vmatprep.subr.bf16.mxu1 %v379_v0  ;;  %v362_v44 = vpack.c.bf16 %v126_v43, %v125_v42  ;;  %v128_v46 = vld [vmem:[%s537_s3 + $0x68] sm:$0xff]  ;;  %v129_v48 = vld [vmem:[%s537_s3 + $0x70] sm:$0xff]  ;;  %v130_v49 = vld [vmem:[%s537_s3 + $0x78] sm:$0xff] }
   0xc   :  { %330 = vmatpush3.bf16.msra.mxu0 %v329_v14  ;;  %v365_v47 = vpack.c.bf16 %v128_v46, %v127_v45  ;;  %v368_v50 = vpack.c.bf16 %v130_v49, %v129_v48  ;;  %v216_v51 = vld [vmem:[%s539_s2] ss:$0 sm:$0xff] }
   0xd   :  { %331 = vmatprep.subr.bf16.mxu0 %v379_v0  ;;  %v217_v56 = vld [vmem:[%s540_s4] ss:$0 sm:$0xff] }
   0xe   :  { %354 = vmatpush3.bf16.msra.mxu1 %v353_v24 }
   0xf   :  { %355 = vmatprep.subr.bf16.mxu1 %v379_v0 }
  0x10   :  { %333 = vmatpush3.bf16.msra.mxu0 %v332_v21 }
  0x11   :  { %334 = vmatprep.subr.bf16.mxu0 %v379_v0 }
  0x12   :  { %357 = vmatpush3.bf16.msra.mxu1 %v356_v30 }
  0x13   :  { %358 = vmatprep.subr.bf16.mxu1 %v379_v0 }
  0x14   :  { %336 = vmatpush3.bf16.msra.mxu0 %v335_v27 }
  0x15   :  { %337 = vmatprep.subr.bf16.mxu0 %v379_v0 }
  0x16   :  { %360 = vmatpush3.bf16.msra.mxu1 %v359_v36 }
  0x17   :  { %361 = vmatprep.subr.bf16.mxu1 %v379_v0 }
  0x18   :  { %339 = vmatpush3.bf16.msra.mxu0 %v338_v33 }
  0x19   :  { %340 = vmatprep.subr.bf16.mxu0 %v379_v0 }
  0x1a   :  { %363 = vmatpush3.bf16.msra.mxu1 %v362_v44 }
  0x1b   :  { %364 = vmatprep.subr.bf16.mxu1 %v379_v0 }
  0x1c   :  { %342 = vmatpush3.bf16.msra.mxu0 %v341_v37 }
  0x1d   :  { %343 = vmatprep.subr.bf16.mxu0 %v379_v0 }
  0x1e   :  { %366 = vmatpush3.bf16.msra.mxu1 %v365_v47 }
  0x1f   :  { %367 = vmatprep.subr.bf16.mxu1 %v379_v0 }
  0x20   :  { %345 = vmatpush3.bf16.msra.mxu0 %v344_v40 }
  0x22   :  { %369 = vmatpush3.bf16.msra.mxu1 %v368_v50 }
  0x23   :  { %285 = vmatmul.mubr.f32.vlgmr.msra.gmra.mrb[0].mxu0 %v20_v41 }
  0xf6   :  { %v110_v52 = vpop.f32.mrb[0].mxu0 }
  0xf7   :  { %v111_v53 = vadd.f32 %v216_v51, %v110_v52  ;;  %v286_v54 = vpop.f32.mrb[1].mxu0 }
  0xf9   :  { %373 = vtanh.f32 %v111_v53 }
 0x103   :  { %v374_v55 = vpop.eup %373 }
 0x104   :  { %320 = vmatmul.mubr.f32.vlgmr.msra.gmra.mrb[0].mxu1 %v374_v55 }
 0x1d7   :  { %v204_v57 = vpop.f32.mrb[0].mxu1 }
 0x1d8   :  { %v205_v58 = vadd.f32 %v217_v56, %v204_v57  ;;  %v321_v59 = vpop.f32.mrb[1].mxu1 }
 0x1da   :  { %375 = vtanh.f32 %v205_v58 }
 0x1e4   :  { %v376_v60 = vpop.eup %375 }
 0x1e5   :  { %v209_v61 = vadd.f32 %v376_v60, %v20_v41 }
 0x1e7   :  { %377 = vtanh.f32 %v209_v61 }
 0x1f1   :  { %v378_v62 = vpop.eup %377 }
 0x1f2   :  { %211 = vst [vmem:[%s541_s5] sm:$0xff] %v378_v62 }

</bundles_post_ra>
